<compile_context>
chip_gen: v7x
topology: tpu7x:2x2x1
jax: 0.10.0
libtpu: 0.0.40
codegen_flags: <defaults>
</compile_context>

<pallas_src>
import functools

import jax
import jax.numpy as jnp
from jax import lax
from jax.experimental import pallas as pl
from jax.experimental.pallas import tpu as pltpu


def _dice_partial_kernel(pred_ref, lab_ref, inter_ref, den_ref,
                         inter_acc, den_acc, *, d, td, tiles_per_slice,
                         num_tiles, gate_tiles, has_tail):
    c = pl.program_id(0)          # parallel slice over D tiles (megacore)
    k = pl.program_id(2)          # reduction step within the slice

    @pl.when(k == 0)
    def _init():
        inter_acc[...] = jnp.zeros_like(inter_acc)
        den_acc[...] = jnp.zeros_like(den_acc)

    tile = c * tiles_per_slice + k        # logical tile index along D

    def _accumulate(mask_tail):
        def _body():
            o = pred_ref[...].astype(jnp.float32)   # native dtype -> f32
            l = lab_ref[...].astype(jnp.float32)
            if mask_tail:
                # int32 column index: assumes d < 2**31 (true for any NCHW).
                col = tile * td + lax.broadcasted_iota(jnp.int32, o.shape, 1)
                valid = col < d
                o = jnp.where(valid, o, 0.0)
                l = jnp.where(valid, l, 0.0)
            # Pure VPU elementwise accumulation; cross-lane reduce deferred.
            inter_acc[...] += o * l
            den_acc[...] += o * o + l * l
        return _body

    if has_tail:
        # Only the last D tile pays for the mask; redundant gated iterations
        # (tile >= num_tiles, possible when num_tiles % p != 0) skip both.
        pl.when(tile == num_tiles - 1)(_accumulate(True))
        pl.when(tile < num_tiles - 1)(_accumulate(False))
    elif gate_tiles:
        pl.when(tile < num_tiles)(_accumulate(False))
    else:
        _accumulate(False)()

    @pl.when(k == tiles_per_slice - 1)
    def _flush():
        # One XLU cross-lane reduce per (slice, row-block).
        inter_ref[...] = jnp.sum(inter_acc[...], axis=1, keepdims=True)[None]
        den_ref[...] = jnp.sum(den_acc[...], axis=1, keepdims=True)[None]


def _pick_fold(n, d):
    """Smallest S dividing d so that n*S fills the 8 sublanes of a vreg."""
    if n >= 8 or d <= 1:
        return 1
    need = -(-8 // n)                       # ceil(8 / n)
    hi = min(d, 8 * need)
    for lane_aligned in (True, False):      # prefer keeping D/S lane-dense
        cands = [s for s in range(need, hi + 1)
                 if d % s == 0 and (not lane_aligned or (d // s) % 128 == 0)]
        for s in cands:
            if (n * s) % 8 == 0:
                return s
        if cands:
            return cands[0]
    return 1


def _tpu_params():
    """(vmem_limit_bytes, num_tensorcores) for the local TPU generation."""
    vmem_cap = 64 * 1024 * 1024
    try:
        vmem_cap = int(getattr(pltpu.get_tpu_info(), "vmem_capacity_bytes",
                               vmem_cap))
    except Exception:
        pass
    num_tc = 1
    try:
        kind = jax.devices()[0].device_kind.lower()
        if any(t in kind for t in ("v4", "v5p", "v7", "7x")):
            num_tc = 2                      # megacore: 2 TensorCores / device
    except Exception:
        pass
    if vmem_cap >= 100 * 1024 * 1024:       # v5e / v6e: 128 MiB physical VMEM
        vmem_limit = 64 * 1024 * 1024
    else:                                   # v7x: 64 MiB per TensorCore
        vmem_limit = 44 * 1024 * 1024
    return vmem_limit, num_tc


def dice_loss(output, label, smooth=1.0, per_image=True, *,
              max_lane_tile=32768, max_rows_tile=None,
              num_parallel_slices=None):
    """Pallas TPU implementation of DiceLoss.forward.  Returns an f32 scalar."""
    assert output.shape == label.shape
    n = int(output.shape[0])
    d_full = 1
    for s in output.shape[1:]:
        d_full *= int(s)

    # --- sublane repacking: (N, D) -> (N*S, D/S) so all 8 sublanes are used --
    fold = _pick_fold(n, d_full)
    rows = n * fold
    d = d_full // fold
    pred2d = output.reshape(rows, d)        # native dtype: no upcast, no pad
    lab2d = label.reshape(rows, d)

    vmem_limit, num_tc = _tpu_params()
    vmem_budget = int(vmem_limit * 0.6)     # headroom for outputs / compiler

    in_bytes = (jnp.dtype(output.dtype).itemsize
                + jnp.dtype(label.dtype).itemsize)
    # VMEM per (row, lane) element: 2 pipeline buffers per input + 2 f32 accs.
    elt_bytes = 2 * in_bytes + 2 * 4

    # --- row tiling (large N): keep lane tiles >= 512 instead of shrinking td
    max_tr = max(8, (vmem_budget // (512 * elt_bytes)) // 8 * 8)
    if max_rows_tile is not None:
        max_tr = max(8, min(max_tr, (int(max_rows_tile) // 8) * 8))
    tr = rows if rows <= max_tr else max_tr
    nr = pl.cdiv(rows, tr)

    # --- lane tile: as wide as the VMEM budget allows (>= ~1 MiB HBM / step) -
    td = min(max_lane_tile, vmem_budget // (tr * elt_bytes))
    td = max(128, (td // 128) * 128)
    if td >= d:
        td = d                              # single full-width tile
    num_tiles = pl.cdiv(d, td)
    has_tail = (d % td) != 0

    p = num_tc if num_parallel_slices is None else int(num_parallel_slices)
    p = max(1, min(p, num_tiles))
    tiles_per_slice = pl.cdiv(num_tiles, p)
    gate_tiles = (p * tiles_per_slice != num_tiles)

    if gate_tiles:
        def in_index(c, r, k):
            return (r, jnp.minimum(c * tiles_per_slice + k, num_tiles - 1))
    else:
        def in_index(c, r, k):
            return (r, c * tiles_per_slice + k)

    kernel = functools.partial(
        _dice_partial_kernel, d=d, td=td, tiles_per_slice=tiles_per_slice,
        num_tiles=num_tiles, gate_tiles=gate_tiles, has_tail=has_tail)

    part_shape = jax.ShapeDtypeStruct((p, nr * tr, 1), jnp.float32)
    part_spec = pl.BlockSpec((1, tr, 1), lambda c, r, k: (c, r, 0))

    inter_p, den_p = pl.pallas_call(
        kernel,
        out_shape=(part_shape, part_shape),
        grid_spec=pltpu.PrefetchScalarGridSpec(
            num_scalar_prefetch=0,
            grid=(p, nr, tiles_per_slice),
            in_specs=[
                pl.BlockSpec((tr, td), in_index),
                pl.BlockSpec((tr, td), in_index),
            ],
            out_specs=(part_spec, part_spec),
            scratch_shapes=[
                pltpu.VMEM((tr, td), jnp.float32),
                pltpu.VMEM((tr, td), jnp.float32),
            ],
        ),
        compiler_params=pltpu.CompilerParams(
            dimension_semantics=("parallel", "parallel", "arbitrary"),
            vmem_limit_bytes=vmem_limit),
        cost_estimate=pl.CostEstimate(
            flops=6 * rows * d, transcendentals=0,
            bytes_accessed=rows * d * in_bytes + 2 * p * nr * tr * 4),
    )(pred2d, lab2d)

    # Tiny JAX epilogue: combine per-slice / per-sub-row partials, form dice.
    inter = jnp.sum(inter_p[:, :rows, 0], axis=0)     # (rows,)
    den = jnp.sum(den_p[:, :rows, 0], axis=0)
    if fold > 1:
        inter = inter.reshape(n, fold).sum(axis=1)    # (N,)
        den = den.reshape(n, fold).sum(axis=1)

    dice = (2.0 * inter + smooth) / (den + smooth)
    per_img_loss = 1.0 - dice
    if per_image:
        return jnp.mean(per_img_loss)
    return jnp.sum(per_img_loss)


def _dice_loss_ref(output, label, smooth=1.0, per_image=True):
    o = output.astype(jnp.float32)
    l = label.astype(jnp.float32)
    axes = tuple(range(1, o.ndim))
    inter = jnp.sum(o * l, axis=axes)
    dice = (2.0 * inter + smooth) / (
        jnp.sum(o * o, axis=axes) + jnp.sum(l * l, axis=axes) + smooth)
    dl = 1.0 - dice
    return jnp.mean(dl) if per_image else jnp.sum(dl)


if __name__ == "__main__":
    key = jax.random.PRNGKey(0)
    k1, k2, k3, k4 = jax.random.split(key, 4)

    # Primary test: N=2 -> sublane repacking (fold=4, rows=8, d=256).
    N, C, H, W = 2, 4, 16, 16
    output = jax.nn.sigmoid(jax.random.normal(k1, (N, C, H, W), jnp.float32))
    label = (jax.random.uniform(k2, (N, C, H, W)) > 0.5).astype(jnp.float32)

    loss_per_image = jax.block_until_ready(
        dice_loss(output, label, smooth=1.0, per_image=True))
    loss_sum = jax.block_until_ready(
        dice_loss(output, label, smooth=1.0, per_image=False))
    ref_per_image = _dice_loss_ref(output, label, 1.0, True)
    ref_sum = _dice_loss_ref(output, label, 1.0, False)
    assert jnp.allclose(loss_per_image, ref_per_image, rtol=1e-5, atol=1e-5), (
        loss_per_image, ref_per_image)
    assert jnp.allclose(loss_sum, ref_sum, rtol=1e-5, atol=1e-5), (
        loss_sum, ref_sum)

    # bf16 inputs: native-dtype streaming, widened to f32 inside the kernel.
    out_bf = output.astype(jnp.bfloat16)
    lab_bf = label.astype(jnp.bfloat16)
    loss_bf = jax.block_until_ready(dice_loss(out_bf, lab_bf, 1.0, True))
    ref_bf = _dice_loss_ref(out_bf, lab_bf, 1.0, True)
    assert jnp.allclose(loss_bf, ref_bf, rtol=1e-4, atol=1e-4), (loss_bf, ref_bf)

    # Multi-tile path on the repacked data (d=256, td forced to 128 -> 2 tiles).
    loss_tiled = jax.block_until_ready(
        dice_loss(output, label, 1.0, True, max_lane_tile=128))
    assert jnp.allclose(loss_tiled, ref_per_image, rtol=1e-5, atol=1e-5), (
        loss_tiled, ref_per_image)

    # Tail mask + gated redundant iterations + row tiling:
    #   rows=9 (no fold), d=300, td=128 -> 3 tiles (44-lane tail), p=2 forced
    #   -> uneven slices, max_rows_tile=8 -> 2 row blocks (partial edge block).
    N2, C2, H2, W2 = 9, 1, 10, 30
    out2 = jax.nn.sigmoid(jax.random.normal(k3, (N2, C2, H2, W2), jnp.float32))
    lab2 = (jax.random.uniform(k4, (N2, C2, H2, W2)) > 0.5).astype(jnp.float32)
    loss_ragged = jax.block_until_ready(
        dice_loss(out2, lab2, 1.0, True, max_lane_tile=128,
                  max_rows_tile=8, num_parallel_slices=2))
    ref_ragged = _dice_loss_ref(out2, lab2, 1.0, True)
    assert jnp.allclose(loss_ragged, ref_ragged, rtol=1e-5, atol=1e-5), (
        loss_ragged, ref_ragged)

    print("KERNEL_OK")
</pallas_src>

<mosaic_0001>
module attributes {stable_mosaic.version = 11 : i64} {
  func.func @_dice_partial_kernel(%arg0: i32, %arg1: i32, %arg2: i32, %arg3: memref<8x256xf32, #tpu.memory_space<vmem>>, %arg4: memref<8x256xf32, #tpu.memory_space<vmem>>, %arg5: memref<1x8x1xf32, #tpu.memory_space<vmem>>, %arg6: memref<1x8x1xf32, #tpu.memory_space<vmem>>, %arg7: memref<8x256xf32, #tpu.memory_space<vmem>>, %arg8: memref<8x256xf32, #tpu.memory_space<vmem>>) attributes {dimension_semantics = [#tpu.dimension_semantics<parallel>, #tpu.dimension_semantics<parallel>, #tpu.dimension_semantics<arbitrary>], iteration_bounds = array<i64: 1, 1, 1>, scalar_prefetch = 0 : i64, scratch_operands = 2 : i64, tpu.core_type = #tpu.core_type<tc>, window_params = [{transform_indices = @transform_0, window_bounds = array<i64: 8, 256>}, {transform_indices = @transform_1, window_bounds = array<i64: 8, 256>}, {transform_indices = @transform_2, window_bounds = array<i64: 1, 8, 1>}, {transform_indices = @transform_3, window_bounds = array<i64: 1, 8, 1>}]} {
    %c0_i32 = arith.constant 0 : i32
    %0 = arith.cmpi eq, %arg2, %c0_i32 : i32
    %1 = arith.extui %0 : i1 to i32
    %c0_i32_0 = arith.constant 0 : i32
    %2 = arith.cmpi ne, %1, %c0_i32_0 : i32
    scf.if %2 {
      %cst = arith.constant 0.000000e+00 : f32
      %18 = vector.broadcast %cst : f32 to vector<8x256xf32>
      %c0_14 = arith.constant 0 : index
      %c0_15 = arith.constant 0 : index
      %19 = vector.load %arg7[%c0_14, %c0_15] : memref<8x256xf32, #tpu.memory_space<vmem>>, vector<8x256xf32>
      tpu.vector_store %arg7[%c0_14, %c0_15], %18 {strides = array<i32>} : memref<8x256xf32, #tpu.memory_space<vmem>>, vector<8x256xf32>,
      %cst_16 = arith.constant 0.000000e+00 : f32
      %20 = vector.broadcast %cst_16 : f32 to vector<8x256xf32>
      %c0_17 = arith.constant 0 : index
      %c0_18 = arith.constant 0 : index
      %21 = vector.load %arg8[%c0_17, %c0_18] : memref<8x256xf32, #tpu.memory_space<vmem>>, vector<8x256xf32>
      tpu.vector_store %arg8[%c0_17, %c0_18], %20 {strides = array<i32>} : memref<8x256xf32, #tpu.memory_space<vmem>>, vector<8x256xf32>,
    } else {
    }
    %c0 = arith.constant 0 : index
    %c0_1 = arith.constant 0 : index
    %3 = vector.load %arg3[%c0, %c0_1] : memref<8x256xf32, #tpu.memory_space<vmem>>, vector<8x256xf32>
    %c0_2 = arith.constant 0 : index
    %c0_3 = arith.constant 0 : index
    %4 = vector.load %arg4[%c0_2, %c0_3] : memref<8x256xf32, #tpu.memory_space<vmem>>, vector<8x256xf32>
    %c0_4 = arith.constant 0 : index
    %c0_5 = arith.constant 0 : index
    %5 = vector.load %arg7[%c0_4, %c0_5] : memref<8x256xf32, #tpu.memory_space<vmem>>, vector<8x256xf32>
    %6 = arith.mulf %3, %4 : vector<8x256xf32>
    %7 = arith.addf %5, %6 : vector<8x256xf32>
    %c0_6 = arith.constant 0 : index
    %c0_7 = arith.constant 0 : index
    %8 = vector.load %arg7[%c0_6, %c0_7] : memref<8x256xf32, #tpu.memory_space<vmem>>, vector<8x256xf32>
    tpu.vector_store %arg7[%c0_6, %c0_7], %7 {strides = array<i32>} : memref<8x256xf32, #tpu.memory_space<vmem>>, vector<8x256xf32>,
    %c0_8 = arith.constant 0 : index
    %c0_9 = arith.constant 0 : index
    %9 = vector.load %arg8[%c0_8, %c0_9] : memref<8x256xf32, #tpu.memory_space<vmem>>, vector<8x256xf32>
    %10 = arith.mulf %3, %3 : vector<8x256xf32>
    %11 = arith.mulf %4, %4 : vector<8x256xf32>
    %12 = arith.addf %10, %11 : vector<8x256xf32>
    %13 = arith.addf %9, %12 : vector<8x256xf32>
    %c0_10 = arith.constant 0 : index
    %c0_11 = arith.constant 0 : index
    %14 = vector.load %arg8[%c0_10, %c0_11] : memref<8x256xf32, #tpu.memory_space<vmem>>, vector<8x256xf32>
    tpu.vector_store %arg8[%c0_10, %c0_11], %13 {strides = array<i32>} : memref<8x256xf32, #tpu.memory_space<vmem>>, vector<8x256xf32>,
    %c0_i32_12 = arith.constant 0 : i32
    %15 = arith.cmpi eq, %arg2, %c0_i32_12 : i32
    %16 = arith.extui %15 : i1 to i32
    %c0_i32_13 = arith.constant 0 : i32
    %17 = arith.cmpi ne, %16, %c0_i32_13 : i32
    scf.if %17 {
      %c0_14 = arith.constant 0 : index
      %c0_15 = arith.constant 0 : index
      %18 = vector.load %arg7[%c0_14, %c0_15] : memref<8x256xf32, #tpu.memory_space<vmem>>, vector<8x256xf32>
      %cst = arith.constant dense<0.000000e+00> : vector<8xf32>
      %19 = vector.multi_reduction <add>, %18, %cst [1] : vector<8x256xf32> to vector<8xf32>
      %20 = vector.shape_cast %19 : vector<8xf32> to vector<8x1xf32>
      %21 = vector.shape_cast %20 : vector<8x1xf32> to vector<1x8x1xf32>
      %c0_16 = arith.constant 0 : index
      %c0_17 = arith.constant 0 : index
      %c0_18 = arith.constant 0 : index
      %22 = vector.load %arg5[%c0_16, %c0_17, %c0_18] : memref<1x8x1xf32, #tpu.memory_space<vmem>>, vector<1x8x1xf32>
      tpu.vector_store %arg5[%c0_16, %c0_17, %c0_18], %21 {strides = array<i32>} : memref<1x8x1xf32, #tpu.memory_space<vmem>>, vector<1x8x1xf32>,
      %c0_19 = arith.constant 0 : index
      %c0_20 = arith.constant 0 : index
      %23 = vector.load %arg8[%c0_19, %c0_20] : memref<8x256xf32, #tpu.memory_space<vmem>>, vector<8x256xf32>
      %cst_21 = arith.constant dense<0.000000e+00> : vector<8xf32>
      %24 = vector.multi_reduction <add>, %23, %cst_21 [1] : vector<8x256xf32> to vector<8xf32>
      %25 = vector.shape_cast %24 : vector<8xf32> to vector<8x1xf32>
      %26 = vector.shape_cast %25 : vector<8x1xf32> to vector<1x8x1xf32>
      %c0_22 = arith.constant 0 : index
      %c0_23 = arith.constant 0 : index
      %c0_24 = arith.constant 0 : index
      %27 = vector.load %arg6[%c0_22, %c0_23, %c0_24] : memref<1x8x1xf32, #tpu.memory_space<vmem>>, vector<1x8x1xf32>
      tpu.vector_store %arg6[%c0_22, %c0_23, %c0_24], %26 {strides = array<i32>} : memref<1x8x1xf32, #tpu.memory_space<vmem>>, vector<1x8x1xf32>,
    } else {
    }
    return
  }
  func.func @transform_0(%arg0: i32, %arg1: i32, %arg2: i32) -> (i32, i32) {
    %c1_i32 = arith.constant 1 : i32
    %0 = arith.muli %arg0, %c1_i32 : i32
    %1 = arith.addi %0, %arg2 : i32
    %c0_i32 = arith.constant 0 : i32
    return %arg1, %1 : i32, i32
  }
  func.func @transform_1(%arg0: i32, %arg1: i32, %arg2: i32) -> (i32, i32) {
    %c1_i32 = arith.constant 1 : i32
    %0 = arith.muli %arg0, %c1_i32 : i32
    %1 = arith.addi %0, %arg2 : i32
    %c0_i32 = arith.constant 0 : i32
    return %arg1, %1 : i32, i32
  }
  func.func @transform_2(%arg0: i32, %arg1: i32, %arg2: i32) -> (i32, i32, i32) {
    %c0_i32 = arith.constant 0 : i32
    %c0_i32_0 = arith.constant 0 : i32
    return %arg0, %arg1, %c0_i32 : i32, i32, i32
  }
  func.func @transform_3(%arg0: i32, %arg1: i32, %arg2: i32) -> (i32, i32, i32) {
    %c0_i32 = arith.constant 0 : i32
    %c0_i32_0 = arith.constant 0 : i32
    return %arg0, %arg1, %c0_i32 : i32, i32, i32
  }
}

</mosaic_0001>

<bundles_post_ra>
// kernel: tpu_custom_call.1
= control target key start
LH: loop header
LB: loop body
LE: loop exit
PB: predicated region body
PF: predicated region fallthrough
CT: control target
= control target key end

     0   :  { %9 = vsyncpa [#allocation5], 0  ;;  %s209_s0 = inlined_call_operand.hbm [shape: f32[8,256], index: 0, kind: input, shape index: {}]   ;;  %s210_s1 = inlined_call_operand.hbm [shape: f32[8,256], index: 1, kind: input, shape index: {}]   ;;  %s211_s2 = inlined_call_operand.vmem [shape: f32[1,8,1], index: 2, kind: output, shape index: {0}]   ;;  %s212_s3 = inlined_call_operand.vmem [shape: f32[1,8,1], index: 3, kind: output, shape index: {1}]  }
   0x1   :  { %10 = vsyncpa [#allocation7], 0  ;;  %s157_s12 = smov [#allocation4]   ;;  %s158_s14 = smov [#allocation6]  }
   0x2   :  { %s21_s13 = sshll.u32 %s157_s12, 4  ;;  %s35_s15 = sshll.u32 %s158_s14, 4  ;;  %s22_s13 = int_to_ptr.vmem [resolvable:$true] %s21_s13  ;;  %s36_s15 = int_to_ptr.vmem [resolvable:$true] %s35_s15 }
   0x3   :  { %s109_s18 = scalar_lea.hbm %s209_s0, 256 }
   0x4   :  { %p110_p0 = scmp.ne.s32.totalorder %s209_s0, %s109_s18  ;;  %p113_p1 = scmp.lt.u32.totalorder %s109_s18, %s209_s0 }
   0x6   :  { %p115_p2 = pnand %p113_p1, %p110_p0 }
   0x8   :  { %118 = shalt.err (!%p115_p2)
}
   0x9   :  { %s119_s23 = scalar_lea.vmem %s22_s13, 256  ;;  %p124_p4 = scmp.lt.s32.totalorder %s22_s13, %s22_s13 }
   0xa   :  { %p120_p3 = scmp.ne.s32.totalorder %s22_s13, %s119_s23  ;;  %p125_p5 = scmp.lt.s32.totalorder %s119_s23, %s119_s23 }
   0xc   :  { %p126_p6 = por %p125_p5, %p124_p4 }
   0xe   :  { %p127_p7 = pnand %p126_p6, %p120_p3 }
  0x10   :  { %130 = shalt.err (!%p127_p7)
}
  0x11   :  { %24 = dma.hbm_to_vmem [thread:$0]  %s209_s0, 256, %s22_s13, [#allocation5]  }
  0x12   :  { %s131_s28 = scalar_lea.hbm %s210_s1, 256 }
  0x13   :  { %p132_p8 = scmp.ne.s32.totalorder %s210_s1, %s131_s28  ;;  %p135_p9 = scmp.lt.u32.totalorder %s131_s28, %s210_s1 }
  0x15   :  { %p137_p10 = pnand %p135_p9, %p132_p8 }
  0x17   :  { %140 = shalt.err (!%p137_p10)
}
  0x18   :  { %s141_s6 = scalar_lea.vmem %s36_s15, 256  ;;  %p146_p12 = scmp.lt.s32.totalorder %s36_s15, %s36_s15 }
  0x19   :  { %p142_p11 = scmp.ne.s32.totalorder %s36_s15, %s141_s6  ;;  %p147_p13 = scmp.lt.s32.totalorder %s141_s6, %s141_s6 }
  0x1b   :  { %p148_p0 = por %p147_p13, %p146_p12 }
  0x1d   :  { %p149_p1 = pnand %p148_p0, %p142_p11 }
  0x1f   :  { %152 = shalt.err (!%p149_p1)
}
  0x20   :  { %38 = dma.hbm_to_vmem [thread:$0]  %s210_s1, 256, %s36_s15, [#allocation7]  }
  0x21   :  { %153 = dma.done.wait [#allocation5], 256  }
  0x22   :  { %154 = vsyncadd [#allocation5], 4294967040 }
  0x23   :  { %155 = dma.done.wait [#allocation7], 256  }
  0x24   :  { %156 = vsyncadd [#allocation7], 4294967040  ;;  %v57_v0 = vld [vmem:[#allocation4] sm:$0xff]  ;;  %v58_v1 = vld [vmem:[#allocation4 + $0x8] sm:$0xff]  ;;  %vm89_vm0 = vcmask 7168  }
  0x25   :  { %v59_v2 = vld [vmem:[#allocation6] sm:$0xff]  ;;  %v60_v3 = vld [vmem:[#allocation6 + $0x8] sm:$0xff]  ;;  %v71_v5 = vmul.f32 %v57_v0, %v57_v0  ;;  %v72_v6 = vmul.f32 %v58_v1, %v58_v1 }
  0x26   :  { %v63_v4 = vmul.f32 %v59_v2, %v57_v0  ;;  %v73_v7 = vmul.f32 %v59_v2, %v59_v2  ;;  %v64_v8 = vmul.f32 %v60_v3, %v58_v1  ;;  %v74_v9 = vmul.f32 %v60_v3, %v60_v3 }
  0x28   :  { %v75_v10 = vadd.f32 %v73_v7, %v71_v5  ;;  %v86_v11 = vadd.f32 %v64_v8, %v63_v4  ;;  %v76_v12 = vadd.f32 %v74_v9, %v72_v6 }
  0x2a   :  { %87 = vadd.xlane.f32.xlu0 %v86_v11  ;;  %v93_v13 = vadd.f32 %v76_v12, %v75_v10 }
  0x2e   :  { %94 = vadd.xlane.f32.xlu0 %v93_v13 }
  0xb7   :  { %v88_v14 = vpop.xlane.xlu0 %87 }
  0xb8   :  { %90 = vst.msk [vmem:[%s211_s2] sm:$0xff] %vm89_vm0, %v88_v14 }
  0xbb   :  { %v95_v15 = vpop.xlane.xlu0 %94 }
  0xbc   :  { %96 = vst.msk [vmem:[%s212_s3] sm:$0xff] %vm89_vm0, %v95_v15 }
  0xbd   :  { %105 = vsyncpa [#allocation5], 1 }
  0xbe   :  { %106 = vsyncpa [#allocation7], 1 }

</bundles_post_ra>
